<compile_context>
chip_gen: v6e
topology: v6e:2x2x1
jax: 0.10.0
libtpu: 0.0.40
codegen_flags: <defaults>
</compile_context>

<pallas_src>
import functools

import jax
import jax.numpy as jnp
from jax import lax
from jax.experimental import pallas as pl
from jax.experimental.pallas import tpu as pltpu

_LANE = 128
_SUBLANE = 8


def _round_up(x, m):
    return ((x + m - 1) // m) * m


def _cdiv(a, b):
    return -(-a // b)


def _pick_block_rows(ho, wo_pad, k_eff, cout_p, in_itemsize, n_batch, block_h):
    """Output rows per grid step (TH)."""
    if block_h is not None:
        return max(1, min(int(block_h), ho))
    # One (input + output) row-block around ~6 MiB so double buffering plus weights stays
    # comfortably inside v7x's 64 MiB VMEM, while v5e/v6e still get large M tiles.
    budget = 6 * 1024 * 1024
    per_row = wo_pad * (k_eff * in_itemsize + cout_p * 4)
    th = max(1, min(ho, budget // max(per_row, 1)))
    # Enough grid steps to feed both v7x TensorCores / keep the pipeline deep at batch 1.
    min_steps = 4
    if n_batch * _cdiv(ho, th) < min_steps:
        th = min(th, max(1, _cdiv(ho, _cdiv(min_steps, n_batch))))
    return th


def _make_kernel(kh_loop, th, w_out, k_eff, cout_p):
    """Fused (sum_kh X_kh @ W_kh) + bias -> ReLU on one (th*w_out, cout_p) row block."""
    m = th * w_out

    def kernel(x_ref, w_ref, b_ref, o_ref):
        # x_ref: (1, 1, th + kh_loop - 1, w_out, k_eff)  halo'd activation row block
        # w_ref: (kh_loop, k_eff, cout_p)                BN-scale-folded weights
        # b_ref: (1, cout_p)                             folded BN bias (f32)
        # o_ref: (1, 1, th*w_out, cout_p)                lane-dense output slab
        # Register/value accumulation: first tap assigns, later taps add (no VMEM scratch,
        # no zero-fill, single store).  KH slices are on the leading (non-tiled) axis and
        # w_out is a multiple of 8, so the reshape below is a free retile.
        win = x_ref[0, 0, 0:th, :, :].reshape(m, k_eff)
        acc = jnp.dot(win, w_ref[0], preferred_element_type=jnp.float32)
        for kh in range(1, kh_loop):
            win = x_ref[0, 0, kh:kh + th, :, :].reshape(m, k_eff)
            acc = acc + jnp.dot(win, w_ref[kh], preferred_element_type=jnp.float32)
        y = jnp.maximum(acc + b_ref[...], 0.0)             # fused BN bias + ReLU (f32)
        o_ref[...] = y.reshape(1, 1, m, cout_p).astype(o_ref.dtype)

    return kernel


@functools.partial(jax.jit,
                   static_argnames=("padding", "eps", "compute_dtype", "block_h"))
def basic_conv2d(x_nchw, w_oihw, gamma, beta, running_mean, running_var,
                 *, padding=1, eps=1e-3, compute_dtype=jnp.bfloat16, block_h=None):
    """Fused Conv2d(bias=False, stride=1) + BatchNorm2d(eval, eps) + ReLU.

    x_nchw : (N, Cin, H, W)      (PyTorch layout)
    w_oihw : (Cout, Cin, KH, KW)
    returns (N, Cout, Ho, Wo) float32
    """
    n, cin, h, w = x_nchw.shape
    cout, _, kh_sz, kw_sz = w_oihw.shape
    ho = h + 2 * padding - kh_sz + 1
    wo = w + 2 * padding - kw_sz + 1

    wo_pad = _round_up(wo, _SUBLANE)          # free retiles + unmasked lane-dense stores
    cout_p = _round_up(cout, _LANE)
    in_itemsize = jnp.dtype(compute_dtype).itemsize

    # ---- fold eval-mode BN into the conv weights (scale) and a bias vector ----
    scale = gamma / jnp.sqrt(running_var + eps)                        # (Cout,)
    bias = beta - running_mean * scale
    w_hwio = jnp.transpose(w_oihw, (2, 3, 1, 0)) * scale               # (KH,KW,Cin,Cout), scaled
    bias_p = jnp.pad(bias, (0, cout_p - cout)).reshape(1, cout_p).astype(jnp.float32)

    # ---- choose the K layout: im2col fold for small Cin, direct conv for large Cin ----
    if cin < _LANE:
        kh_loop = 1
        k_real = kh_sz * kw_sz * cin          # fold (kh, kw, cin) -> K, padded once to 128
    else:
        kh_loop = kh_sz
        k_real = kw_sz * cin                  # fold (kw, cin) -> K (>= 384 for 3x3 convs)
    k_eff = _round_up(k_real, _LANE)
    halo = kh_loop - 1

    th = _pick_block_rows(ho, wo_pad, k_eff, cout_p, in_itemsize, n, block_h)
    n_hb = _cdiv(ho, th)
    ho_pad = n_hb * th

    # ---- wrapper glue (plain JAX): layout, zero-pad, K-fold, row blocking ----
    hp = ho_pad + kh_sz - 1
    wp = wo_pad + kw_sz - 1
    x_nhwc = jnp.transpose(x_nchw, (0, 2, 3, 1)).astype(compute_dtype)
    x_p = jnp.pad(x_nhwc, ((0, 0), (padding, hp - h - padding),
                           (padding, wp - w - padding), (0, 0)))

    if kh_loop == 1:
        # im2col: one (th*wo_pad, k_eff) x (k_eff, cout_p) matmul per row block.
        taps = [x_p[:, i:i + ho_pad, j:j + wo_pad, :]
                for i in range(kh_sz) for j in range(kw_sz)]
        xk = jnp.concatenate(taps, axis=-1)               # (N, Ho_pad, Wo_pad, KH*KW*Cin)
        xk = jnp.pad(xk, ((0, 0), (0, 0), (0, 0), (0, k_eff - k_real)))
        x_blocks = xk.reshape(n, n_hb, th, wo_pad, k_eff)  # non-overlapping row blocks
        w_mat = w_hwio.reshape(1, k_real, cout)
    else:
        # direct conv: fold kw into K, loop over kh in-kernel on a halo'd row block
        # (~(TH+KH-1)/TH duplication instead of keeping the full sample resident).
        taps = [x_p[:, :, j:j + wo_pad, :] for j in range(kw_sz)]
        xk = jnp.concatenate(taps, axis=-1)               # (N, Hp, Wo_pad, KW*Cin)
        xk = jnp.pad(xk, ((0, 0), (0, 0), (0, 0), (0, k_eff - k_real)))
        rows = jnp.arange(n_hb)[:, None] * th + jnp.arange(th + halo)[None, :]
        x_blocks = xk[:, rows]                            # (N, n_hb, TH+KH-1, Wo_pad, K_eff)
        w_mat = w_hwio.reshape(kh_sz, k_real, cout)

    w_mat = jnp.pad(w_mat, ((0, 0), (0, k_eff - k_real),
                            (0, cout_p - cout))).astype(compute_dtype)

    kernel = _make_kernel(kh_loop, th, wo_pad, k_eff, cout_p)
    m = th * wo_pad

    # VMEM estimate: double-buffered input/output blocks + (two) weight buffers + bias.
    # The TH budget keeps this <= ~48 MiB so v7x's 64 MiB/TC has headroom.
    in_blk = (th + halo) * wo_pad * k_eff * in_itemsize
    out_blk = m * cout_p * 4
    w_bytes = kh_loop * k_eff * cout_p * in_itemsize
    need = 2 * (in_blk + out_blk) + 2 * w_bytes + 2 * cout_p * 4 + (1 << 20)
    vmem_limit = max(32 * 1024 * 1024, min(int(need * 1.25), 128 * 1024 * 1024))

    out_blocks = pl.pallas_call(
        kernel,
        out_shape=jax.ShapeDtypeStruct((n, n_hb, m, cout_p), jnp.float32),
        grid_spec=pltpu.PrefetchScalarGridSpec(
            num_scalar_prefetch=0,
            grid=(n, n_hb),
            in_specs=[
                # Halo'd activation row block for this (sample, row-block) grid point.
                pl.BlockSpec((1, 1, th + halo, wo_pad, k_eff),
                             lambda ni, hi: (ni, hi, 0, 0, 0)),
                # Weights / bias are grid-invariant (constant block index) -> DMA'd once.
                pl.BlockSpec((kh_loop, k_eff, cout_p), lambda ni, hi: (0, 0, 0)),
                pl.BlockSpec((1, cout_p), lambda ni, hi: (0, 0)),
            ],
            out_specs=pl.BlockSpec((1, 1, m, cout_p), lambda ni, hi: (ni, hi, 0, 0)),
        ),
        compiler_params=pltpu.CompilerParams(
            dimension_semantics=("parallel", "parallel"),
            vmem_limit_bytes=vmem_limit,
        ),
    )(x_blocks, w_mat, bias_p)

    # Free metadata reshape; strip row/column/channel padding; back to NCHW.
    out = out_blocks.reshape(n, ho_pad, wo_pad, cout_p)[:, :ho, :wo, :cout]
    return jnp.transpose(out, (0, 3, 1, 2))


def _reference(x_nchw, w_oihw, gamma, beta, running_mean, running_var,
               *, padding=1, eps=1e-3):
    y = lax.conv_general_dilated(
        x_nchw, w_oihw, window_strides=(1, 1),
        padding=((padding, padding), (padding, padding)),
        dimension_numbers=("NCHW", "OIHW", "NCHW"),
        precision=lax.Precision.HIGHEST)
    scale = (gamma / jnp.sqrt(running_var + eps)).reshape(1, -1, 1, 1)
    shift = (beta - running_mean * gamma / jnp.sqrt(running_var + eps)).reshape(1, -1, 1, 1)
    return jnp.maximum(y * scale + shift, 0.0)


def _make_params(key, n, cin, cout, h, w, khw):
    ks = jax.random.split(key, 6)
    x = jax.random.normal(ks[0], (n, cin, h, w), dtype=jnp.float32)
    wgt = jax.random.normal(ks[1], (cout, cin, khw, khw), dtype=jnp.float32)
    wgt = wgt / (khw * (cin ** 0.5))
    gamma = jax.random.uniform(ks[2], (cout,), minval=0.5, maxval=1.5, dtype=jnp.float32)
    beta = jax.random.normal(ks[3], (cout,), dtype=jnp.float32) * 0.1
    rmean = jax.random.normal(ks[4], (cout,), dtype=jnp.float32) * 0.1
    rvar = jax.random.uniform(ks[5], (cout,), minval=0.5, maxval=1.5, dtype=jnp.float32)
    return x, wgt, gamma, beta, rmean, rvar


if __name__ == "__main__":
    root = jax.random.PRNGKey(0)
    key1, key2, key3 = jax.random.split(root, 3)

    # --- test 1: BasicConv2d(4 -> 8, k=3, padding=1), im2col path, f32 + default bf16 ---
    N, Cin, H, W, Cout = 2, 4, 16, 16, 8
    x, wgt, gamma, beta, rmean, rvar = _make_params(key1, N, Cin, Cout, H, W, 3)
    ref = _reference(x, wgt, gamma, beta, rmean, rvar, padding=1)

    out_f32 = basic_conv2d(x, wgt, gamma, beta, rmean, rvar,
                           padding=1, compute_dtype=jnp.float32)
    out_f32 = jax.block_until_ready(out_f32)
    assert out_f32.shape == (N, Cout, H, W)
    assert jnp.allclose(out_f32, ref, rtol=1e-4, atol=1e-4), (
        float(jnp.max(jnp.abs(out_f32 - ref))))

    out_bf16 = basic_conv2d(x, wgt, gamma, beta, rmean, rvar, padding=1)  # default bf16
    out_bf16 = jax.block_until_ready(out_bf16)
    assert out_bf16.shape == (N, Cout, H, W)
    assert jnp.allclose(out_bf16, ref, rtol=3e-2, atol=3e-2), (
        float(jnp.max(jnp.abs(out_bf16 - ref))))

    # --- test 2: odd spatial size (Wo % 8 != 0 -> padded W tiles), im2col path ---
    x2, w2, g2, b2, m2, v2 = _make_params(key2, 1, 4, 8, 9, 9, 3)
    ref2 = _reference(x2, w2, g2, b2, m2, v2, padding=1)
    out2 = basic_conv2d(x2, w2, g2, b2, m2, v2, padding=1, compute_dtype=jnp.float32)
    out2 = jax.block_until_ready(out2)
    assert out2.shape == (1, 8, 9, 9)
    assert jnp.allclose(out2, ref2, rtol=1e-3, atol=1e-3), (
        float(jnp.max(jnp.abs(out2 - ref2))))

    # --- test 3: Cin >= 128 (direct-conv path: halo'd row blocks + in-kernel KH loop) ---
    x3, w3, g3, b3, m3, v3 = _make_params(key3, 1, 128, 16, 8, 8, 3)
    ref3 = _reference(x3, w3, g3, b3, m3, v3, padding=1)
    out3 = basic_conv2d(x3, w3, g3, b3, m3, v3, padding=1, compute_dtype=jnp.float32)
    out3 = jax.block_until_ready(out3)
    assert out3.shape == (1, 16, 8, 8)
    assert jnp.allclose(out3, ref3, rtol=1e-3, atol=1e-3), (
        float(jnp.max(jnp.abs(out3 - ref3))))

    print("KERNEL_OK")
</pallas_src>

<mosaic_0001>
module attributes {stable_mosaic.version = 11 : i64} {
  func.func @kernel(%arg0: i32, %arg1: i32, %arg2: memref<1x1x8x16x128xf32, #tpu.memory_space<vmem>>, %arg3: memref<1x128x128xf32, #tpu.memory_space<vmem>>, %arg4: memref<1x128xf32, #tpu.memory_space<vmem>>, %arg5: memref<1x1x128x128xf32, #tpu.memory_space<vmem>>) attributes {dimension_semantics = [#tpu.dimension_semantics<parallel>, #tpu.dimension_semantics<parallel>], iteration_bounds = array<i64: 2, 2>, scalar_prefetch = 0 : i64, scratch_operands = 0 : i64, tpu.core_type = #tpu.core_type<tc>, window_params = [{transform_indices = @transform_0, window_bounds = array<i64: 1, 1, 8, 16, 128>}, {pipeline_mode = #tpu.pipeline_mode<synchronous>, transform_indices = @transform_1, window_bounds = array<i64: 1, 128, 128>}, {pipeline_mode = #tpu.pipeline_mode<synchronous>, transform_indices = @transform_2, window_bounds = array<i64: 1, 128>}, {transform_indices = @transform_3, window_bounds = array<i64: 1, 1, 128, 128>}]} {
    %c0 = arith.constant 0 : index
    %c0_0 = arith.constant 0 : index
    %c0_1 = arith.constant 0 : index
    %c0_2 = arith.constant 0 : index
    %c0_3 = arith.constant 0 : index
    %0 = vector.load %arg2[%c0, %c0_0, %c0_1, %c0_2, %c0_3] : memref<1x1x8x16x128xf32, #tpu.memory_space<vmem>>, vector<1x1x8x16x128xf32>
    %1 = vector.shape_cast %0 : vector<1x1x8x16x128xf32> to vector<8x16x128xf32>
    %2 = vector.shape_cast %1 : vector<8x16x128xf32> to vector<128x128xf32>
    %c0_4 = arith.constant 0 : index
    %c0_5 = arith.constant 0 : index
    %c0_6 = arith.constant 0 : index
    %3 = vector.load %arg3[%c0_4, %c0_5, %c0_6] : memref<1x128x128xf32, #tpu.memory_space<vmem>>, vector<1x128x128xf32>
    %4 = vector.shape_cast %3 : vector<1x128x128xf32> to vector<128x128xf32>
    %cst = arith.constant dense<0.000000e+00> : vector<128x128xf32>
    %5 = tpu.matmul %2, %4, %cst {dimension_numbers = #tpu.dot_dimension_numbers<[1], [0], [0], [1], [0, 0, 1, 1], [], []>} : vector<128x128xf32>, vector<128x128xf32>, vector<128x128xf32> -> vector<128x128xf32>
    %c0_7 = arith.constant 0 : index
    %c0_8 = arith.constant 0 : index
    %6 = vector.load %arg4[%c0_7, %c0_8] : memref<1x128xf32, #tpu.memory_space<vmem>>, vector<1x128xf32>
    %7 = vector.broadcast %6 : vector<1x128xf32> to vector<128x128xf32>
    %8 = arith.addf %5, %7 : vector<128x128xf32>
    %cst_9 = arith.constant 0.000000e+00 : f32
    %9 = vector.broadcast %cst_9 : f32 to vector<128x128xf32>
    %10 = arith.maximumf %8, %9 : vector<128x128xf32>
    %11 = vector.shape_cast %10 : vector<128x128xf32> to vector<1x1x128x128xf32>
    %c0_10 = arith.constant 0 : index
    %c0_11 = arith.constant 0 : index
    %c0_12 = arith.constant 0 : index
    %c0_13 = arith.constant 0 : index
    %12 = vector.load %arg5[%c0_10, %c0_11, %c0_12, %c0_13] : memref<1x1x128x128xf32, #tpu.memory_space<vmem>>, vector<1x1x128x128xf32>
    tpu.vector_store %arg5[%c0_10, %c0_11, %c0_12, %c0_13], %11 {strides = array<i32>} : memref<1x1x128x128xf32, #tpu.memory_space<vmem>>, vector<1x1x128x128xf32>,
    return
  }
  func.func @transform_0(%arg0: i32, %arg1: i32) -> (i32, i32, i32, i32, i32) {
    %c0_i32 = arith.constant 0 : i32
    %c0_i32_0 = arith.constant 0 : i32
    %c0_i32_1 = arith.constant 0 : i32
    %c0_i32_2 = arith.constant 0 : i32
    return %arg0, %arg1, %c0_i32, %c0_i32_0, %c0_i32_1 : i32, i32, i32, i32, i32
  }
  func.func @transform_1(%arg0: i32, %arg1: i32) -> (i32, i32, i32) {
    %c0_i32 = arith.constant 0 : i32
    %c0_i32_0 = arith.constant 0 : i32
    %c0_i32_1 = arith.constant 0 : i32
    %c0_i32_2 = arith.constant 0 : i32
    return %c0_i32, %c0_i32_0, %c0_i32_1 : i32, i32, i32
  }
  func.func @transform_2(%arg0: i32, %arg1: i32) -> (i32, i32) {
    %c0_i32 = arith.constant 0 : i32
    %c0_i32_0 = arith.constant 0 : i32
    %c0_i32_1 = arith.constant 0 : i32
    return %c0_i32, %c0_i32_0 : i32, i32
  }
  func.func @transform_3(%arg0: i32, %arg1: i32) -> (i32, i32, i32, i32) {
    %c0_i32 = arith.constant 0 : i32
    %c0_i32_0 = arith.constant 0 : i32
    %c0_i32_1 = arith.constant 0 : i32
    return %arg0, %arg1, %c0_i32, %c0_i32_0 : i32, i32, i32, i32
  }
}

</mosaic_0001>

<bundles_post_ra>
// kernel: basic_conv2d.1
= control target key start
LH: loop header
LB: loop body
LE: loop exit
PB: predicated region body
PF: predicated region fallthrough
CT: control target
= control target key end

     0   :  { %s752_s12 = smov 0   ;;  %s754_s13 = smov 0   ;;  %s905_s0 = inlined_call_operand.vmem [shape: f32[2,2,8,16,128], index: 0, kind: input, shape index: {}]   ;;  %s906_s1 = inlined_call_operand.vmem [shape: f32[1,128,128], index: 1, kind: input, shape index: {}]   ;;  %s907_s2 = inlined_call_operand.vmem [shape: f32[1,128], index: 2, kind: input, shape index: {}]   ;;  %s908_s3 = inlined_call_operand.vmem [shape: f32[2,2,128,128], index: 3, kind: output, shape index: {}]  }
   0x1   :  { %s756_s14 = smov 0   ;;  %s758_s15 = smov 0  }
   0x2   :  { %s760_s16 = smov 0  }
   0x3 LB: > { %s22_s17 = sadd.s32 1, %s722_s14  ;;  %s25_s18 = sadd.s32 1, %s726_s15  ;;  %s730_s16 = sphi %s760_s16, %s13_s16   ;;  %s726_s15 = sphi %s758_s15, %s912_s15   ;;  %s722_s14 = sphi %s756_s14, %s911_s14   ;;  %s718_s13 = sphi %s754_s13, %s910_s13   ;;  %s714_s12 = sphi %s752_s12, %s909_s12  }
   0x4   : > { %p23_p0 = scmp.ge.s32.totalorder %s22_s17, 2  ;;  %p522_p1 = scmp.ge.s32.totalorder %s730_s16, 1 }
   0x5   : > { %p157_p2 = scmp.lt.s32.totalorder %s730_s16, 5 }
   0x6   : > { %s914_s17 = smov (%p23_p0, %s22_s17), 0  ;;  %s916_s18 = smov (!%p23_p0, %s25_s18), %s726_s15 }
   0x7   : > { %p158_p3 = pnand %p522_p1, %p157_p2  ;;  %p27_p4 = scmp.ge.s32.totalorder %s916_s18, 2 }
   0x8   : > { %p189_p5 = scmp.lt.s32.totalorder (!%p158_p3), %s718_s13, 1  ;;  %p191_p6 = scmp.lt.s32.totalorder (!%p158_p3), %s714_s12, 1 }
   0x9   : > { %s918_s18 = smov (%p27_p4, %s916_s18), 0  ;;  %161 = sbr.rel (%p158_p3) target bundleno = 260 (0x104), region = 32 }
   0xe   : > { %v238_v0 = vld [vmem:[%s906_s1 + $0x78] sm:$0xff]  ;;  %v237_v1 = vld [vmem:[%s906_s1 + $0x70] sm:$0xff]  ;;  %v236_v2 = vld [vmem:[%s906_s1 + $0x68] sm:$0xff]  ;;  %s920_s13 = smov (!%p189_p5, %s718_s13), 1  ;;  %s922_s12 = smov (!%p191_p6, %s714_s12), 1 }
   0xf   : > { %564 = vmatprep.subr.mxu0 %v238_v0  ;;  %620 = vmatprep.subr.mxu1 %v238_v0  ;;  %v235_v3 = vld [vmem:[%s906_s1 + $0x60] sm:$0xff]  ;;  %v234_v4 = vld [vmem:[%s906_s1 + $0x58] sm:$0xff]  ;;  %v233_v5 = vld [vmem:[%s906_s1 + $0x50] sm:$0xff]  ;;  %s523_s21 = sshll.u32 %s922_s12, 4  ;;  %s524_s22 = sshll.u32 %s920_s13, 5 }
  0x10   : > { %565 = vmatpush3.msra.mxu0 %v238_v0  ;;  %636 = vmatpush3.msra.mxu1 %v238_v0  ;;  %v232_v6 = vld [vmem:[%s906_s1 + $0x48] sm:$0xff]  ;;  %v231_v7 = vld [vmem:[%s906_s1 + $0x40] sm:$0xff]  ;;  %v230_v8 = vld [vmem:[%s906_s1 + $0x38] sm:$0xff]  ;;  %s826_s25 = sadd.s32 %s524_s22, %s523_s21 }
  0x11   : > { %566 = vmatprep.subr.mxu0 %v237_v1  ;;  %621 = vmatprep.subr.mxu1 %v237_v1  ;;  %v229_v9 = vld [vmem:[%s906_s1 + $0x30] sm:$0xff]  ;;  %v228_v10 = vld [vmem:[%s906_s1 + $0x28] sm:$0xff]  ;;  %v227_v11 = vld [vmem:[%s906_s1 + $0x20] sm:$0xff]  ;;  %s525_s28 = sshll.u32 %s826_s25, 3 }
  0x12   : > { %567 = vmatpush3.msra.mxu0 %v237_v1  ;;  %637 = vmatpush3.msra.mxu1 %v237_v1  ;;  %v226_v12 = vld [vmem:[%s906_s1 + $0x18] sm:$0xff]  ;;  %v225_v13 = vld [vmem:[%s906_s1 + $0x10] sm:$0xff]  ;;  %v224_v14 = vld [vmem:[%s906_s1 + $0x8] sm:$0xff]  ;;  %s843_s6 = scalar_lea.vmem %s905_s0, %s525_s28  ;;  %s872_s20 = scalar_lea.vmem %s908_s3, %s525_s28 }
  0x13   : > { %568 = vmatprep.subr.mxu0 %v236_v2  ;;  %622 = vmatprep.subr.mxu1 %v236_v2  ;;  %v223_v15 = vld [vmem:[%s906_s1] sm:$0xff]  ;;  %v208_v18 = vld [vmem:[%s843_s6 + $0x8] sm:$0xff]  ;;  %v209_v20 = vld [vmem:[%s843_s6 + $0x10] sm:$0xff] }
  0x14   : > { %569 = vmatpush3.msra.mxu0 %v236_v2  ;;  %638 = vmatpush3.msra.mxu1 %v236_v2  ;;  %v207_v16 = vld [vmem:[%s843_s6] sm:$0xff]  ;;  %v216_v19 = vld [vmem:[%s843_s6 + $0x48] sm:$0xff]  ;;  %v217_v21 = vld [vmem:[%s843_s6 + $0x50] sm:$0xff] }
  0x15   : > { %570 = vmatprep.subr.mxu0 %v235_v3  ;;  %623 = vmatprep.subr.mxu1 %v235_v3  ;;  %v215_v17 = vld [vmem:[%s843_s6 + $0x40] sm:$0xff]  ;;  %v210_v22 = vld [vmem:[%s843_s6 + $0x18] sm:$0xff]  ;;  %v212_v26 = vld [vmem:[%s843_s6 + $0x28] sm:$0xff] }
  0x16   : > { %571 = vmatpush3.msra.mxu0 %v235_v3  ;;  %639 = vmatpush3.msra.mxu1 %v235_v3  ;;  %v218_v23 = vld [vmem:[%s843_s6 + $0x58] sm:$0xff]  ;;  %v211_v24 = vld [vmem:[%s843_s6 + $0x20] sm:$0xff]  ;;  %v220_v27 = vld [vmem:[%s843_s6 + $0x68] sm:$0xff] }
  0x17   : > { %572 = vmatprep.subr.mxu0 %v234_v4  ;;  %624 = vmatprep.subr.mxu1 %v234_v4  ;;  %v219_v25 = vld [vmem:[%s843_s6 + $0x60] sm:$0xff]  ;;  %v213_v28 = vld [vmem:[%s843_s6 + $0x30] sm:$0xff]  ;;  %v214_v30 = vld [vmem:[%s843_s6 + $0x38] sm:$0xff] }
  0x18   : > { %573 = vmatpush3.msra.mxu0 %v234_v4  ;;  %640 = vmatpush3.msra.mxu1 %v234_v4  ;;  %v221_v29 = vld [vmem:[%s843_s6 + $0x70] sm:$0xff]  ;;  %v222_v31 = vld [vmem:[%s843_s6 + $0x78] sm:$0xff]  ;;  %v529_v32 = vld [vmem:[%s907_s2] ss:$0 sm:$0xff] }
  0x19   : > { %574 = vmatprep.subr.mxu0 %v233_v5  ;;  %625 = vmatprep.subr.mxu1 %v233_v5 }
  0x1a   : > { %575 = vmatpush3.msra.mxu0 %v233_v5  ;;  %641 = vmatpush3.msra.mxu1 %v233_v5 }
  0x1b   : > { %576 = vmatprep.subr.mxu0 %v232_v6  ;;  %626 = vmatprep.subr.mxu1 %v232_v6 }
  0x1c   : > { %577 = vmatpush3.msra.mxu0 %v232_v6  ;;  %642 = vmatpush3.msra.mxu1 %v232_v6 }
  0x1d   : > { %578 = vmatprep.subr.mxu0 %v231_v7  ;;  %627 = vmatprep.subr.mxu1 %v231_v7 }
  0x1e   : > { %579 = vmatpush3.msra.mxu0 %v231_v7  ;;  %643 = vmatpush3.msra.mxu1 %v231_v7 }
  0x1f   : > { %580 = vmatprep.subr.mxu0 %v230_v8  ;;  %628 = vmatprep.subr.mxu1 %v230_v8 }
  0x20   : > { %581 = vmatpush3.msra.mxu0 %v230_v8  ;;  %644 = vmatpush3.msra.mxu1 %v230_v8 }
  0x21   : > { %582 = vmatprep.subr.mxu0 %v229_v9  ;;  %629 = vmatprep.subr.mxu1 %v229_v9 }
  0x22   : > { %583 = vmatpush3.msra.mxu0 %v229_v9  ;;  %645 = vmatpush3.msra.mxu1 %v229_v9 }
  0x23   : > { %584 = vmatprep.subr.mxu0 %v228_v10  ;;  %630 = vmatprep.subr.mxu1 %v228_v10 }
  0x24   : > { %585 = vmatpush3.msra.mxu0 %v228_v10  ;;  %646 = vmatpush3.msra.mxu1 %v228_v10 }
  0x25   : > { %586 = vmatprep.subr.mxu0 %v227_v11  ;;  %631 = vmatprep.subr.mxu1 %v227_v11 }
  0x26   : > { %587 = vmatpush3.msra.mxu0 %v227_v11  ;;  %647 = vmatpush3.msra.mxu1 %v227_v11 }
  0x27   : > { %588 = vmatprep.subr.mxu0 %v226_v12  ;;  %632 = vmatprep.subr.mxu1 %v226_v12 }
  0x28   : > { %589 = vmatpush3.msra.mxu0 %v226_v12  ;;  %648 = vmatpush3.msra.mxu1 %v226_v12 }
  0x29   : > { %590 = vmatprep.subr.mxu0 %v225_v13  ;;  %633 = vmatprep.subr.mxu1 %v225_v13 }
  0x2a   : > { %591 = vmatpush3.msra.mxu0 %v225_v13  ;;  %649 = vmatpush3.msra.mxu1 %v225_v13 }
  0x2b   : > { %592 = vmatprep.subr.mxu0 %v224_v14  ;;  %634 = vmatprep.subr.mxu1 %v224_v14 }
  0x2c   : > { %593 = vmatpush3.msra.mxu0 %v224_v14  ;;  %650 = vmatpush3.msra.mxu1 %v224_v14 }
  0x2d   : > { %594 = vmatprep.subr.mxu0 %v223_v15  ;;  %635 = vmatprep.subr.mxu1 %v223_v15 }
  0x2e   : > { %595 = vmatpush3.msra.mxu0 %v223_v15  ;;  %651 = vmatpush3.msra.mxu1 %v223_v15 }
  0x2f   : > { %596 = vmatprep.mubr.f32.mxu0 %v207_v16  ;;  %608 = vmatprep.mubr.f32.mxu1 %v215_v17 }
  0x30   : > { %597 = vmatmul.mubr.f32.vlgmr.msra.gmra.mxu0 %v208_v18  ;;  %609 = vmatmul.mubr.f32.vlgmr.msra.gmra.mxu1 %v216_v19 }
  0x31   : > { %599 = vmatprep.mubr.f32.mxu0 %v209_v20  ;;  %611 = vmatprep.mubr.f32.mxu1 %v217_v21 }
  0x34   : > { %600 = vmatmul.mubr.f32.gmra.mxu0 %v210_v22  ;;  %612 = vmatmul.mubr.f32.gmra.mxu1 %v218_v23 }
  0x35   : > { %602 = vmatprep.mubr.f32.mxu0 %v211_v24  ;;  %614 = vmatprep.mubr.f32.mxu1 %v219_v25 }
  0x38   : > { %603 = vmatmul.mubr.f32.gmra.mxu0 %v212_v26  ;;  %615 = vmatmul.mubr.f32.gmra.mxu1 %v220_v27 }
  0x39   : > { %605 = vmatprep.mubr.f32.mxu0 %v213_v28  ;;  %617 = vmatprep.mubr.f32.mxu1 %v221_v29 }
  0x3c   : > { %606 = vmatmul.mubr.f32.gmra.mxu0 %v214_v30  ;;  %618 = vmatmul.mubr.f32.gmra.mxu1 %v222_v31 }
  0xf0   : > { %v598_v33 = vpop.f32.mrf.mxu0  ;;  %v610_v34 = vpop.f32.mrf.mxu1 }
  0xf1   : > { %v318_v35 = vadd.f32 %v598_v33, %v529_v32  ;;  %v358_v36 = vadd.f32 %v610_v34, %v529_v32 }
  0xf2   : > { %v312_v37 = vpop.f32.mrf.mxu0  ;;  %v352_v38 = vpop.f32.mrf.mxu1 }
  0xf3   : > { %v392_v39 = vmax.f32 %v318_v35, 0.0  ;;  %v400_v40 = vmax.f32 %v358_v36, 0.0  ;;  %v313_v41 = vadd.f32 %v529_v32, %v312_v37  ;;  %v353_v42 = vadd.f32 %v529_v32, %v352_v38 }
  0xf4   : > { %v601_v43 = vpop.f32.mrf.mxu0  ;;  %v613_v44 = vpop.f32.mrf.mxu1 }
  0xf5   : > { %408 = vst [vmem:[%s872_s20 + $0x8] sm:$0xff] %v392_v39  ;;  %416 = vst [vmem:[%s872_s20 + $0x48] sm:$0xff] %v400_v40  ;;  %v391_v45 = vmax.f32 %v313_v41, 0.0  ;;  %v399_v46 = vmax.f32 %v353_v42, 0.0  ;;  %v328_v47 = vadd.f32 %v601_v43, %v529_v32  ;;  %v368_v48 = vadd.f32 %v613_v44, %v529_v32 }
  0xf6   : > { %v322_v49 = vpop.f32.mrf.mxu0  ;;  %v362_v50 = vpop.f32.mrf.mxu1 }
  0xf7   : > { %407 = vst [vmem:[%s872_s20] sm:$0xff] %v391_v45  ;;  %415 = vst [vmem:[%s872_s20 + $0x40] sm:$0xff] %v399_v46  ;;  %v394_v51 = vmax.f32 %v328_v47, 0.0  ;;  %v402_v52 = vmax.f32 %v368_v48, 0.0  ;;  %v323_v53 = vadd.f32 %v529_v32, %v322_v49  ;;  %v363_v54 = vadd.f32 %v529_v32, %v362_v50 }
  0xf8   : > { %v604_v55 = vpop.f32.mrf.mxu0  ;;  %v616_v56 = vpop.f32.mrf.mxu1 }
  0xf9   : > { %410 = vst [vmem:[%s872_s20 + $0x18] sm:$0xff] %v394_v51  ;;  %418 = vst [vmem:[%s872_s20 + $0x58] sm:$0xff] %v402_v52  ;;  %v393_v57 = vmax.f32 %v323_v53, 0.0  ;;  %v401_v58 = vmax.f32 %v363_v54, 0.0  ;;  %v338_v59 = vadd.f32 %v604_v55, %v529_v32  ;;  %v378_v60 = vadd.f32 %v616_v56, %v529_v32 }
  0xfa   : > { %v332_v61 = vpop.f32.mrf.mxu0  ;;  %v372_v62 = vpop.f32.mrf.mxu1 }
  0xfb   : > { %409 = vst [vmem:[%s872_s20 + $0x10] sm:$0xff] %v393_v57  ;;  %417 = vst [vmem:[%s872_s20 + $0x50] sm:$0xff] %v401_v58  ;;  %v396_v63 = vmax.f32 %v338_v59, 0.0  ;;  %v404_v0 = vmax.f32 %v378_v60, 0.0  ;;  %v333_v1 = vadd.f32 %v529_v32, %v332_v61  ;;  %v373_v2 = vadd.f32 %v529_v32, %v372_v62 }
  0xfc   : > { %v607_v3 = vpop.f32.mrf.mxu0  ;;  %v619_v4 = vpop.f32.mrf.mxu1 }
  0xfd   : > { %412 = vst [vmem:[%s872_s20 + $0x28] sm:$0xff] %v396_v63  ;;  %420 = vst [vmem:[%s872_s20 + $0x68] sm:$0xff] %v404_v0  ;;  %v395_v5 = vmax.f32 %v333_v1, 0.0  ;;  %v403_v6 = vmax.f32 %v373_v2, 0.0  ;;  %v348_v7 = vadd.f32 %v607_v3, %v529_v32  ;;  %v388_v8 = vadd.f32 %v619_v4, %v529_v32 }
  0xfe   : > { %v342_v9 = vpop.f32.mrf.mxu0  ;;  %v382_v10 = vpop.f32.mrf.mxu1 }
  0xff   : > { %411 = vst [vmem:[%s872_s20 + $0x20] sm:$0xff] %v395_v5  ;;  %419 = vst [vmem:[%s872_s20 + $0x60] sm:$0xff] %v403_v6  ;;  %v398_v11 = vmax.f32 %v348_v7, 0.0  ;;  %v406_v12 = vmax.f32 %v388_v8, 0.0  ;;  %v343_v13 = vadd.f32 %v529_v32, %v342_v9  ;;  %v383_v14 = vadd.f32 %v529_v32, %v382_v10 }
 0x101   : > { %414 = vst [vmem:[%s872_s20 + $0x38] sm:$0xff] %v398_v11  ;;  %422 = vst [vmem:[%s872_s20 + $0x78] sm:$0xff] %v406_v12  ;;  %v397_v15 = vmax.f32 %v343_v13, 0.0  ;;  %v405_v16 = vmax.f32 %v383_v14, 0.0 }
 0x103   : > { %413 = vst [vmem:[%s872_s20 + $0x30] sm:$0xff] %v397_v15  ;;  %421 = vst [vmem:[%s872_s20 + $0x70] sm:$0xff] %v405_v16 }
 0x104 PF: > { %s13_s16 = sadd.s32 1, %s730_s16   ;;  %s909_s12 = smov %s722_s14 }
 0x105   : > { %p10_p7 = scmp.ge.s32.totalorder %s13_s16, 6   ;;  %s910_s13 = smov %s726_s15 }
 0x106   : > { %s911_s14 = smov %s914_s17  ;;  %s912_s15 = smov %s918_s18 }
 0x107   :  { %12 = sbr.rel (!%p10_p7) target bundleno = 3 (0x3), region = 62 }

</bundles_post_ra>
